<compile_context>
chip_gen: v7x
topology: tpu7x:2x2x1
jax: 0.10.0
libtpu: 0.0.40
codegen_flags: <defaults>
</compile_context>

<pallas_src>
import jax
import jax.numpy as jnp
from jax.experimental import pallas as pl
from jax.experimental.pallas import tpu as pltpu


# ----------------------------------------------------------------------------
# Glue: resize geometry + separable resample weights (plain JAX, tiny)
# ----------------------------------------------------------------------------
def _cdiv(a, b):
    return -(-a // b)


def _round_up(a, m):
    return _cdiv(a, m) * m


def _resize_output_size(h, w, size):
    # torchvision F.resize with a single int: shorter edge -> size, keep aspect.
    # TODO(synk): torchvision may round the long edge; int() truncation kept here.
    if h <= w:
        return size, int(size * w / h)
    return int(size * h / w), size


def _bilinear_weights(in_size, out_size):
    # torchvision bilinear (align_corners=False, no antialias):
    #   src = (dst + 0.5) * in/out - 0.5, clamp gathered indices.
    scale = in_size / out_size
    dst = jnp.arange(out_size, dtype=jnp.float32)
    src = (dst + 0.5) * scale - 0.5
    x0 = jnp.floor(src)
    lam = src - x0
    i0 = jnp.clip(x0.astype(jnp.int32), 0, in_size - 1)
    i1 = jnp.clip(x0.astype(jnp.int32) + 1, 0, in_size - 1)
    oh0 = jax.nn.one_hot(i0, in_size, dtype=jnp.float32)
    oh1 = jax.nn.one_hot(i1, in_size, dtype=jnp.float32)
    return (1.0 - lam)[:, None] * oh0 + lam[:, None] * oh1  # (out, in)


def _nearest_indices(in_size, out_size):
    # torchvision InterpolationMode.NEAREST: src = floor(dst * in/out)
    idx = jnp.floor(
        jnp.arange(out_size, dtype=jnp.float32) * (in_size / out_size)
    ).astype(jnp.int32)
    return jnp.clip(idx, 0, in_size - 1)


# ----------------------------------------------------------------------------
# Wrapper (the nn.Module forward equivalent)
# ----------------------------------------------------------------------------
def voc_eval(img_u8, resize_size,
             mean=(0.485, 0.456, 0.406),
             std=(0.229, 0.224, 0.225),
             target_u8=None):
    N, C, H, W = img_u8.shape
    Ho, Wo = _resize_output_size(H, W, resize_size)

    # --- padded / tiled geometry -------------------------------------------
    # Keep a >=2 "parallel" Ho-tile axis (both v7x TensorCores busy at N=1).
    n_ho_tiles = 2 if Ho >= 16 else 1
    THO = _round_up(_cdiv(Ho, n_ho_tiles), 16)      # 16: bf16 sublane tile
    HO_PAD = THO * n_ho_tiles
    WO_PAD = _round_up(Wo, 128)                     # lane-dense output stores

    # --- weights / epilogue constants (bf16 MXU inputs, f32 epilogue) -------
    wh_f32 = _bilinear_weights(H, Ho)               # (Ho, H)
    wh = jnp.zeros((HO_PAD, H), jnp.float32).at[:Ho].set(wh_f32)
    wh = wh.astype(jnp.bfloat16)                    # (HO_PAD, H)

    ww_f32 = _bilinear_weights(W, Wo)               # (Wo, W)
    wwt = jnp.zeros((W, WO_PAD), jnp.float32).at[:, :Wo].set(ww_f32.T)
    wwt = wwt.astype(jnp.bfloat16)                  # (W, WO_PAD)

    mean_arr = jnp.asarray(mean, dtype=jnp.float32)
    std_arr = jnp.asarray(std, dtype=jnp.float32)
    scale = 1.0 / (255.0 * std_arr)                 # folds convert_image_dtype
    bias = mean_arr / std_arr                       # (x/255 - m)/s == x*scale - bias

    # --- the Pallas kernel: one (n, Ho-tile) block, all C channels ----------
    def _img_resize_norm_kernel(scale_ref, bias_ref, img_ref, wh_ref, wwt_ref,
                                out_ref):
        wh_t = wh_ref[...]                          # (THO, H)   bf16
        wwt_t = wwt_ref[...]                        # (W, WO_PAD) bf16
        for c in range(C):                          # static unroll (C == 3)
            # u8 -> f32 -> bf16 in-kernel (pixel values 0..255 exact in bf16).
            x = img_ref[0, c].astype(jnp.float32).astype(jnp.bfloat16)  # (H, W)
            # vertical pass (this Ho tile only), f32 accumulation on the MXU
            v = jnp.dot(wh_t, x, preferred_element_type=jnp.float32)    # (THO, W)
            # horizontal pass, lane-padded output
            y = jnp.dot(v.astype(jnp.bfloat16), wwt_t,
                        preferred_element_type=jnp.float32)             # (THO, WO_PAD)
            # fused convert_image_dtype + normalize: y*scale[c] - bias[c]
            out_ref[0, c] = y * scale_ref[c] - bias_ref[c]

    img_out_pad = pl.pallas_call(
        _img_resize_norm_kernel,
        out_shape=jax.ShapeDtypeStruct((N, C, HO_PAD, WO_PAD), jnp.float32),
        grid=(N, n_ho_tiles),
        in_specs=[
            pl.BlockSpec(memory_space=pltpu.MemorySpace.SMEM),            # scale (C,)
            pl.BlockSpec(memory_space=pltpu.MemorySpace.SMEM),            # bias  (C,)
            pl.BlockSpec((1, C, H, W), lambda n, t: (n, 0, 0, 0)),        # u8 image
            pl.BlockSpec((THO, H), lambda n, t: (t, 0)),                  # Wh tile
            pl.BlockSpec((W, WO_PAD), lambda n, t: (0, 0)),               # Ww^T
        ],
        out_specs=pl.BlockSpec((1, C, THO, WO_PAD), lambda n, t: (n, 0, t, 0)),
        compiler_params=pltpu.CompilerParams(
            dimension_semantics=("parallel", "parallel"),
            # Raise the scoped VMEM limit (img block is double-buffered); stays
            # under every generation's physical VMEM.  For multi-megapixel
            # inputs, additionally tile the W/Wo axis.
            vmem_limit_bytes=64 * 1024 * 1024),
    )(scale, bias, img_u8, wh, wwt)

    # slice off the Ho / lane padding (padding rows/cols carry only -bias)
    img_out = img_out_pad[:, :, :Ho, :Wo]

    # --- target: NEAREST resize is a pure gather -> plain JAX (perf review) --
    # NOTE: PyTorch's `if target:` is truthiness; here we branch on presence.
    tgt_out = None
    if target_u8 is not None:
        Ht, Wt = target_u8.shape[-2], target_u8.shape[-1]
        Hto, Wto = _resize_output_size(Ht, Wt, resize_size)
        rows = _nearest_indices(Ht, Hto)
        cols = _nearest_indices(Wt, Wto)
        t = jnp.take(jnp.take(target_u8, rows, axis=-2), cols, axis=-1)
        # TODO(synk): PyTorch casts to int64; int32 emitted (x64 off by default).
        tgt_out = t[0].astype(jnp.int32)            # squeeze(0) + integer cast

    return img_out, tgt_out


# ----------------------------------------------------------------------------
# Pure-JAX f32 reference for the image path (validation only)
# ----------------------------------------------------------------------------
def _voc_eval_image_ref(img_u8, resize_size, mean, std):
    N, C, H, W = img_u8.shape
    Ho, Wo = _resize_output_size(H, W, resize_size)
    wh = _bilinear_weights(H, Ho)                   # (Ho, H)
    ww = _bilinear_weights(W, Wo)                   # (Wo, W)
    x = img_u8.astype(jnp.float32)
    y = jnp.einsum('oh,nchw->ncow', wh, x)
    y = jnp.einsum('pw,ncow->ncop', ww, y)
    y = y / 255.0
    m = jnp.asarray(mean, jnp.float32)[None, :, None, None]
    s = jnp.asarray(std, jnp.float32)[None, :, None, None]
    return (y - m) / s


# ----------------------------------------------------------------------------
if __name__ == "__main__":
    key = jax.random.PRNGKey(0)
    k_img, k_tgt = jax.random.split(key)

    N, C, H, W = 2, 3, 16, 20
    resize_size = 24
    mean = (0.485, 0.456, 0.406)
    std = (0.229, 0.224, 0.225)

    img_u8 = jax.random.randint(k_img, (N, C, H, W), 0, 256,
                                dtype=jnp.int32).astype(jnp.uint8)
    tgt_u8 = jax.random.randint(k_tgt, (1, H, W), 0, 21,
                                dtype=jnp.int32).astype(jnp.uint8)

    img_out, tgt_out = voc_eval(img_u8, resize_size, mean=mean, std=std,
                                target_u8=tgt_u8)
    jax.block_until_ready(img_out)
    jax.block_until_ready(tgt_out)

    # Shape / dtype sanity (shorter edge H=16 -> 24, W scaled 20 -> 30).
    assert img_out.shape == (N, C, 24, 30), img_out.shape
    assert img_out.dtype == jnp.float32
    assert tgt_out.shape == (24, 30), tgt_out.shape
    assert tgt_out.dtype == jnp.int32

    # Numerical check against a pure-JAX f32 reference.  bf16 MXU inputs bound
    # the error well below torchvision's own uint8 re-quantization after resize.
    ref = _voc_eval_image_ref(img_u8, resize_size, mean, std)
    max_err = float(jnp.max(jnp.abs(img_out - ref)))
    assert max_err < 0.1, f"max abs error vs f32 reference: {max_err}"

    # Target values must be valid VOC-style class ids from the input range.
    assert int(jnp.min(tgt_out)) >= 0 and int(jnp.max(tgt_out)) < 21

    print("KERNEL_OK")
</pallas_src>

<mosaic_0001>
module attributes {stable_mosaic.version = 11 : i64} {
  func.func @_img_resize_norm_kernel(%arg0: i32, %arg1: i32, %arg2: memref<3xf32, #tpu.memory_space<smem>>, %arg3: memref<3xf32, #tpu.memory_space<smem>>, %arg4: memref<1x3x16x20xi8, #tpu.memory_space<vmem>>, %arg5: memref<16x16xbf16, #tpu.memory_space<vmem>>, %arg6: memref<20x128xbf16, #tpu.memory_space<vmem>>, %arg7: memref<1x3x16x128xf32, #tpu.memory_space<vmem>>) attributes {dimension_semantics = [#tpu.dimension_semantics<parallel>, #tpu.dimension_semantics<parallel>], iteration_bounds = array<i64: 2, 2>, scalar_prefetch = 0 : i64, scratch_operands = 0 : i64, tpu.core_type = #tpu.core_type<tc>, window_params = [{transform_indices = @transform_0, window_bounds = array<i64: 3>}, {transform_indices = @transform_1, window_bounds = array<i64: 3>}, {transform_indices = @transform_2, window_bounds = array<i64: 1, 3, 16, 20>}, {transform_indices = @transform_3, window_bounds = array<i64: 16, 16>}, {pipeline_mode = #tpu.pipeline_mode<synchronous>, transform_indices = @transform_4, window_bounds = array<i64: 20, 128>}, {transform_indices = @transform_5, window_bounds = array<i64: 1, 3, 16, 128>}]} {
    %c0 = arith.constant 0 : index
    %c0_0 = arith.constant 0 : index
    %0 = vector.load %arg5[%c0, %c0_0] : memref<16x16xbf16, #tpu.memory_space<vmem>>, vector<16x16xbf16>
    %c0_1 = arith.constant 0 : index
    %c0_2 = arith.constant 0 : index
    %1 = vector.load %arg6[%c0_1, %c0_2] : memref<20x128xbf16, #tpu.memory_space<vmem>>, vector<20x128xbf16>
    %c0_3 = arith.constant 0 : index
    %c0_4 = arith.constant 0 : index
    %c0_5 = arith.constant 0 : index
    %c0_6 = arith.constant 0 : index
    %2 = vector.load %arg4[%c0_3, %c0_4, %c0_5, %c0_6] : memref<1x3x16x20xi8, #tpu.memory_space<vmem>>, vector<1x1x16x20xi8>
    %3 = vector.shape_cast %2 : vector<1x1x16x20xi8> to vector<16x20xi8>
    %4 = arith.uitofp %3 : vector<16x20xi8> to vector<16x20xf32>
    %5 = arith.truncf %4 : vector<16x20xf32> to vector<16x20xbf16>
    %cst = arith.constant dense<0.000000e+00> : vector<16x20xf32>
    %6 = tpu.matmul %0, %5, %cst {dimension_numbers = #tpu.dot_dimension_numbers<[1], [0], [0], [1], [0, 0, 1, 1], [], []>} : vector<16x16xbf16>, vector<16x20xbf16>, vector<16x20xf32> -> vector<16x20xf32>
    %7 = arith.truncf %6 : vector<16x20xf32> to vector<16x20xbf16>
    %cst_7 = arith.constant dense<0.000000e+00> : vector<16x128xf32>
    %8 = tpu.matmul %7, %1, %cst_7 {dimension_numbers = #tpu.dot_dimension_numbers<[1], [0], [0], [1], [0, 0, 1, 1], [], []>} : vector<16x20xbf16>, vector<20x128xbf16>, vector<16x128xf32> -> vector<16x128xf32>
    %c0_8 = arith.constant 0 : index
    %9 = memref.load %arg2[%c0_8] : memref<3xf32, #tpu.memory_space<smem>>
    %10 = vector.broadcast %9 : f32 to vector<16x128xf32>
    %11 = arith.mulf %8, %10 : vector<16x128xf32>
    %c0_9 = arith.constant 0 : index
    %12 = memref.load %arg3[%c0_9] : memref<3xf32, #tpu.memory_space<smem>>
    %13 = vector.broadcast %12 : f32 to vector<16x128xf32>
    %14 = arith.subf %11, %13 : vector<16x128xf32>
    %c0_10 = arith.constant 0 : index
    %c0_11 = arith.constant 0 : index
    %c0_12 = arith.constant 0 : index
    %c0_13 = arith.constant 0 : index
    %15 = vector.load %arg7[%c0_10, %c0_11, %c0_12, %c0_13] : memref<1x3x16x128xf32, #tpu.memory_space<vmem>>, vector<1x1x16x128xf32>
    %16 = vector.shape_cast %15 : vector<1x1x16x128xf32> to vector<16x128xf32>
    %17 = vector.shape_cast %14 : vector<16x128xf32> to vector<1x1x16x128xf32>
    tpu.vector_store %arg7[%c0_10, %c0_11, %c0_12, %c0_13], %17 {strides = array<i32>} : memref<1x3x16x128xf32, #tpu.memory_space<vmem>>, vector<1x1x16x128xf32>,
    %c0_14 = arith.constant 0 : index
    %c1 = arith.constant 1 : index
    %c0_15 = arith.constant 0 : index
    %c0_16 = arith.constant 0 : index
    %18 = vector.load %arg4[%c0_14, %c1, %c0_15, %c0_16] : memref<1x3x16x20xi8, #tpu.memory_space<vmem>>, vector<1x1x16x20xi8>
    %19 = vector.shape_cast %18 : vector<1x1x16x20xi8> to vector<16x20xi8>
    %20 = arith.uitofp %19 : vector<16x20xi8> to vector<16x20xf32>
    %21 = arith.truncf %20 : vector<16x20xf32> to vector<16x20xbf16>
    %cst_17 = arith.constant dense<0.000000e+00> : vector<16x20xf32>
    %22 = tpu.matmul %0, %21, %cst_17 {dimension_numbers = #tpu.dot_dimension_numbers<[1], [0], [0], [1], [0, 0, 1, 1], [], []>} : vector<16x16xbf16>, vector<16x20xbf16>, vector<16x20xf32> -> vector<16x20xf32>
    %23 = arith.truncf %22 : vector<16x20xf32> to vector<16x20xbf16>
    %cst_18 = arith.constant dense<0.000000e+00> : vector<16x128xf32>
    %24 = tpu.matmul %23, %1, %cst_18 {dimension_numbers = #tpu.dot_dimension_numbers<[1], [0], [0], [1], [0, 0, 1, 1], [], []>} : vector<16x20xbf16>, vector<20x128xbf16>, vector<16x128xf32> -> vector<16x128xf32>
    %c1_19 = arith.constant 1 : index
    %25 = memref.load %arg2[%c1_19] : memref<3xf32, #tpu.memory_space<smem>>
    %26 = vector.broadcast %25 : f32 to vector<16x128xf32>
    %27 = arith.mulf %24, %26 : vector<16x128xf32>
    %c1_20 = arith.constant 1 : index
    %28 = memref.load %arg3[%c1_20] : memref<3xf32, #tpu.memory_space<smem>>
    %29 = vector.broadcast %28 : f32 to vector<16x128xf32>
    %30 = arith.subf %27, %29 : vector<16x128xf32>
    %c0_21 = arith.constant 0 : index
    %c1_22 = arith.constant 1 : index
    %c0_23 = arith.constant 0 : index
    %c0_24 = arith.constant 0 : index
    %31 = vector.load %arg7[%c0_21, %c1_22, %c0_23, %c0_24] : memref<1x3x16x128xf32, #tpu.memory_space<vmem>>, vector<1x1x16x128xf32>
    %32 = vector.shape_cast %31 : vector<1x1x16x128xf32> to vector<16x128xf32>
    %33 = vector.shape_cast %30 : vector<16x128xf32> to vector<1x1x16x128xf32>
    tpu.vector_store %arg7[%c0_21, %c1_22, %c0_23, %c0_24], %33 {strides = array<i32>} : memref<1x3x16x128xf32, #tpu.memory_space<vmem>>, vector<1x1x16x128xf32>,
    %c0_25 = arith.constant 0 : index
    %c2 = arith.constant 2 : index
    %c0_26 = arith.constant 0 : index
    %c0_27 = arith.constant 0 : index
    %34 = vector.load %arg4[%c0_25, %c2, %c0_26, %c0_27] : memref<1x3x16x20xi8, #tpu.memory_space<vmem>>, vector<1x1x16x20xi8>
    %35 = vector.shape_cast %34 : vector<1x1x16x20xi8> to vector<16x20xi8>
    %36 = arith.uitofp %35 : vector<16x20xi8> to vector<16x20xf32>
    %37 = arith.truncf %36 : vector<16x20xf32> to vector<16x20xbf16>
    %cst_28 = arith.constant dense<0.000000e+00> : vector<16x20xf32>
    %38 = tpu.matmul %0, %37, %cst_28 {dimension_numbers = #tpu.dot_dimension_numbers<[1], [0], [0], [1], [0, 0, 1, 1], [], []>} : vector<16x16xbf16>, vector<16x20xbf16>, vector<16x20xf32> -> vector<16x20xf32>
    %39 = arith.truncf %38 : vector<16x20xf32> to vector<16x20xbf16>
    %cst_29 = arith.constant dense<0.000000e+00> : vector<16x128xf32>
    %40 = tpu.matmul %39, %1, %cst_29 {dimension_numbers = #tpu.dot_dimension_numbers<[1], [0], [0], [1], [0, 0, 1, 1], [], []>} : vector<16x20xbf16>, vector<20x128xbf16>, vector<16x128xf32> -> vector<16x128xf32>
    %c2_30 = arith.constant 2 : index
    %41 = memref.load %arg2[%c2_30] : memref<3xf32, #tpu.memory_space<smem>>
    %42 = vector.broadcast %41 : f32 to vector<16x128xf32>
    %43 = arith.mulf %40, %42 : vector<16x128xf32>
    %c2_31 = arith.constant 2 : index
    %44 = memref.load %arg3[%c2_31] : memref<3xf32, #tpu.memory_space<smem>>
    %45 = vector.broadcast %44 : f32 to vector<16x128xf32>
    %46 = arith.subf %43, %45 : vector<16x128xf32>
    %c0_32 = arith.constant 0 : index
    %c2_33 = arith.constant 2 : index
    %c0_34 = arith.constant 0 : index
    %c0_35 = arith.constant 0 : index
    %47 = vector.load %arg7[%c0_32, %c2_33, %c0_34, %c0_35] : memref<1x3x16x128xf32, #tpu.memory_space<vmem>>, vector<1x1x16x128xf32>
    %48 = vector.shape_cast %47 : vector<1x1x16x128xf32> to vector<16x128xf32>
    %49 = vector.shape_cast %46 : vector<16x128xf32> to vector<1x1x16x128xf32>
    tpu.vector_store %arg7[%c0_32, %c2_33, %c0_34, %c0_35], %49 {strides = array<i32>} : memref<1x3x16x128xf32, #tpu.memory_space<vmem>>, vector<1x1x16x128xf32>,
    return
  }
  func.func @transform_0(%arg0: i32, %arg1: i32) -> i32 {
    %c0_i32 = arith.constant 0 : i32
    %c0_i32_0 = arith.constant 0 : i32
    return %c0_i32 : i32
  }
  func.func @transform_1(%arg0: i32, %arg1: i32) -> i32 {
    %c0_i32 = arith.constant 0 : i32
    %c0_i32_0 = arith.constant 0 : i32
    return %c0_i32 : i32
  }
  func.func @transform_2(%arg0: i32, %arg1: i32) -> (i32, i32, i32, i32) {
    %c0_i32 = arith.constant 0 : i32
    %c0_i32_0 = arith.constant 0 : i32
    %c0_i32_1 = arith.constant 0 : i32
    %c0_i32_2 = arith.constant 0 : i32
    return %arg0, %c0_i32, %c0_i32_0, %c0_i32_1 : i32, i32, i32, i32
  }
  func.func @transform_3(%arg0: i32, %arg1: i32) -> (i32, i32) {
    %c0_i32 = arith.constant 0 : i32
    %c0_i32_0 = arith.constant 0 : i32
    return %arg1, %c0_i32 : i32, i32
  }
  func.func @transform_4(%arg0: i32, %arg1: i32) -> (i32, i32) {
    %c0_i32 = arith.constant 0 : i32
    %c0_i32_0 = arith.constant 0 : i32
    %c0_i32_1 = arith.constant 0 : i32
    return %c0_i32, %c0_i32_0 : i32, i32
  }
  func.func @transform_5(%arg0: i32, %arg1: i32) -> (i32, i32, i32, i32) {
    %c0_i32 = arith.constant 0 : i32
    %c0_i32_0 = arith.constant 0 : i32
    %c0_i32_1 = arith.constant 0 : i32
    return %arg0, %c0_i32, %arg1, %c0_i32_0 : i32, i32, i32, i32
  }
}

</mosaic_0001>

<bundles_post_ra>
// kernel: tpu_custom_call.1
= control target key start
LH: loop header
LB: loop body
LE: loop exit
PB: predicated region body
PF: predicated region fallthrough
CT: control target
= control target key end

     0   :  { %s1894_s0 = inlined_call_operand.hbm [shape: f32[3], index: 0, kind: input, shape index: {}]   ;;  %s1895_s1 = inlined_call_operand.hbm [shape: f32[3], index: 1, kind: input, shape index: {}]   ;;  %s1896_s2 = inlined_call_operand.hbm [shape: u8[2,3,16,20], index: 2, kind: input, shape index: {}]   ;;  %s1897_s3 = inlined_call_operand.hbm [shape: bf16[32,16], index: 3, kind: input, shape index: {}]   ;;  %s1898_s4 = inlined_call_operand.hbm [shape: bf16[20,128], index: 4, kind: input, shape index: {}]   ;;  %s1899_s5 = inlined_call_operand.hbm [shape: f32[2,3,32,128], index: 5, kind: output, shape index: {}]  }
   0x1   :  { %1918 = sst [smem:[#allocation30_spill]] %s1894_s0 }
   0x2   :  { %1919 = sst [smem:[#allocation31_spill]] %s1895_s1 }
   0x3   :  { %1920 = sst [smem:[#allocation32_spill]] %s1896_s2 }
   0x4   :  { %1921 = sst [smem:[#allocation33_spill]] %s1898_s4 }
   0x5   :  { %1922 = sst [smem:[#allocation34_spill]] %s1899_s5 }
   0x6   :  { %10 = vsyncpa [#allocation5], 0 }
   0x7   :  { %11 = vsyncpa [#allocation7], 0 }
   0x8   :  { %12 = vsyncpa [#allocation3], 0 }
   0x9   :  { %14 = vsyncpa [#allocation3 + $0x1], 0 }
   0xa   :  { %15 = vsyncpa [#allocation10], 0 }
   0xb   :  { %17 = vsyncpa [#allocation10 + $0x1], 0 }
   0xc   :  { %18 = vsyncpa [#allocation4], 0 }
   0xd   :  { %20 = vsyncpa [#allocation4 + $0x1], 0  ;;  %s1462_s18 = smov 0   ;;  %s1464_s19 = smov 0  }
   0xe   :  { %s1466_s20 = smov 0   ;;  %s1468_s21 = smov 0  }
   0xf   :  { %s1470_s22 = smov 0   ;;  %s1472_s23 = smov 0  }
  0x10   :  { %s1474_s24 = smov 0   ;;  %s1476_s25 = smov 0  }
  0x11   :  { %s1478_s26 = smov 0   ;;  %s1480_s27 = smov 0  }
  0x12   :  { %s1482_s28 = smov 0   ;;  %s1484_s29 = smov 0  }
  0x13   :  { %s1486_s30 = smov 0   ;;  %s1488_s6 = smov 0  }
  0x14 LB: > { %1923 = sst [smem:[#allocation21_spill]] %s1360_s18  ;;  %s1529_s7 = sadd.s32 4294967295, %s1412_s6   ;;  %s1412_s6 = sphi %s1488_s6, %s26_s6   ;;  %s1408_s30 = sphi %s1486_s30, %s1984_s30   ;;  %s1404_s29 = sphi %s1484_s29, %s1983_s29   ;;  %s1400_s28 = sphi %s1482_s28, %s1982_s28   ;;  %s1396_s27 = sphi %s1480_s27, %s1981_s27   ;;  %s1392_s26 = sphi %s1478_s26, %s1980_s26   ;;  %s1388_s25 = sphi %s1476_s25, %s1979_s25   ;;  %s1384_s24 = sphi %s1474_s24, %s1978_s24   ;;  %s1380_s23 = sphi %s1472_s23, %s1977_s23   ;;  %s1376_s22 = sphi %s1470_s22, %s1976_s22   ;;  %s1372_s21 = sphi %s1468_s21, %s1971_s21   ;;  %s1368_s20 = sphi %s1466_s20, %s1975_s20   ;;  %s1364_s19 = sphi %s1464_s19, %s1974_s19   ;;  %s1360_s18 = sphi %s1462_s18, %s1970_s18  }
  0x15   : > { %1924 = sst [smem:[#allocation22_spill]] %s1364_s19  ;;  %s874_s8 = sadd.s32 4294967294, %s1412_s6  }
  0x16   : > { %1925 = sst [smem:[#allocation23_spill]] %s1376_s22  ;;  %p100_p0 = scmp.ne.s32.totalorder %s1388_s25, %s1384_s24 }
  0x17   : > { %1926 = sst [smem:[#allocation24_spill]] %s1396_s27  ;;  %p1902_p1 = scmp.eq.s32.totalorder %s1529_s7, 0 }
  0x18   : > { %1927 = sst [smem:[#allocation25_spill]] %s1400_s28  ;;  %p126_p2 = scmp.ne.s32.totalorder %s1376_s22, %s1372_s21 }
  0x19   : > { %p172_p3 = scmp.ne.s32.totalorder %s1368_s20, %s1364_s19  ;;  %p1539_p4 = por %p1902_p1, %p100_p0 }
  0x1a   : > { %p173_p5 = scmp.eq.s32.totalorder %s1529_s7, 3  ;;  %p1546_p6 = por %p126_p2, %p1902_p1 }
  0x1b   : > { %s1928_s9 = scalar_select %p1539_p4, 1, 0 }
  0x1c   : > { %s1929_s10 = scalar_select %p1546_p6, 1, 0 }
  0x1d   : > { %p178_p7 = scmp.ne.s32.totalorder %s1364_s19, %s1360_s18  ;;  %p1552_p8 = por %p173_p5, %p172_p3 }
  0x1e   : > { %1930 = sst [smem:[#allocation26_spill]] %s1929_s10  ;;  %p179_p9 = scmp.eq.s32.totalorder %s874_s8, 3 }
  0x1f   : > { %s1931_s11 = scalar_select %p1552_p8, 1, 0 }
  0x20   : > { %p875_p10 = scmp.ge.s32.totalorder %s1412_s6, 1  ;;  %p186_p11 = scmp.lt.s32.totalorder %s1412_s6, 5 }
  0x21   : > { %1932 = sst [smem:[#allocation27_spill]] %s1931_s11  ;;  %p1558_p12 = por %p179_p9, %p178_p7 }
  0x22   : > { %p1562_p13 = pnand %p875_p10, %p186_p11  ;;  %s1414_s14 = smov [#allocation11]  }
  0x23   : > { %s1933_s12 = scalar_select %p1558_p12, 1, 0 }
  0x24   : > { %s1935_s13 = scalar_select %p1562_p13, 1, 0 }
  0x25   : > { %1934 = sst [smem:[#allocation28_spill]] %s1933_s12  ;;  %s216_s15 = sshll.u32 %s1414_s14, 4  ;;  %s217_s15 = int_to_ptr.vmem [resolvable:$true] %s216_s15 }
  0x26   : > { %p1004_p0 = pneg %p1562_p13  ;;  %s1937_s4 = sld [smem:[#allocation33_spill]] }
  0x28   : > { %p1570_p2 = pnand %p1004_p0, %p1902_p1 }
  0x2a   : > { %p1166_p5 = pneg %p1570_p2 }
  0x2c   : > { %s1164_s24 = scalar_lea.hbm %s1937_s4, 192 }
  0x2d   : > { %p1165_p3 = scmp.ne.s32.totalorder %s1937_s4, %s1164_s24  ;;  %p1171_p10 = scmp.lt.u32.totalorder %s1164_s24, %s1937_s4 }
  0x2f   : > { %p1167_p7 = pnand %p1166_p5, %p1165_p3 }
  0x31   : > { %p1168_p9 = pneg %p1167_p7 }
  0x33   : > { %p1173_p11 = pnand %p1171_p10, %p1168_p9 }
  0x35   : > { %1176 = shalt.err (!%p1173_p11)
}
  0x36   : > { %s1177_s17 = scalar_lea.vmem %s217_s15, 192  ;;  %p1185_p8 = scmp.lt.s32.totalorder %s217_s15, %s217_s15 }
  0x37   : > { %p1178_p0 = scmp.ne.s32.totalorder %s217_s15, %s1177_s17  ;;  %p1186_p6 = scmp.lt.s32.totalorder %s1177_s17, %s1177_s17 }
  0x39   : > { %p1180_p1 = pnand %p1178_p0, %p1166_p5  ;;  %p1187_p4 = por %p1186_p6, %p1185_p8 }
  0x3b   : > { %p1181_p12 = pneg %p1180_p1 }
  0x3d   : > { %p1188_p13 = pnand %p1187_p4, %p1181_p12 }
  0x3f   : > { %1191 = shalt.err (!%p1188_p13)
}
  0x40   : > { %s1909_s12 = smov 64   ;;  %s1910_s21 = smov 4  }
  0x41   : > { %1013 = dma.hbm_to_vmem [thread:$0]  (!%p1570_p2), %s1937_s4, 192, %s217_s15, [#allocation10], %s1909_s12, %s1909_s12, %s1910_s21  }
  0x42   : > { %s1938_s0 = sld [smem:[#allocation30_spill]] }
  0x48   : > { %s1192_s5 = scalar_lea.hbm %s1938_s0, 16 }
  0x49   : > { %p1193_p1 = scmp.ne.s32.totalorder %s1938_s0, %s1192_s5  ;;  %p1199_p8 = scmp.lt.u32.totalorder %s1192_s5, %s1938_s0 }
  0x4b   : > { %p1195_p4 = pnand %p1193_p1, %p1166_p5 }
  0x4d   : > { %p1196_p6 = pneg %p1195_p4 }
  0x4f   : > { %p1201_p12 = pnand %p1199_p8, %p1196_p6 }
  0x51   : > { %1204 = shalt.err (!%p1201_p12)
}
  0x52   : > { %s1417_s18 = smov [#allocation2]   ;;  %s1939_s1 = sld [smem:[#allocation31_spill]] }
  0x53   : > { %1007 = dma.hbm_to_smem (!%p1570_p2), %s1938_s0, 16, %s1417_s18, [#allocation5]  }
  0x58   : > { %s1205_s14 = scalar_lea.hbm %s1939_s1, 16 }
  0x59   : > { %p1206_p13 = scmp.ne.s32.totalorder %s1939_s1, %s1205_s14  ;;  %p1212_p9 = scmp.lt.u32.totalorder %s1205_s14, %s1939_s1 }
  0x5b   : > { %p1208_p3 = pnand %p1206_p13, %p1166_p5 }
  0x5d   : > { %p1209_p7 = pneg %p1208_p3 }
  0x5f   : > { %p1214_p10 = pnand %p1212_p9, %p1209_p7 }
  0x61   : > { %1217 = shalt.err (!%p1214_p10)
}
  0x62   : > { %s1418_s28 = smov [#allocation6]   ;;  %p94_p5 = scmp.ne.s32.totalorder %s1392_s26, %s1388_s25 }
  0x63   : > { %1010 = dma.hbm_to_smem (!%p1570_p2), %s1939_s1, 16, %s1418_s28, [#allocation7]  }
  0x64   : > { %p95_p11 = scmp.eq.s32.totalorder %s1412_s6, 0  ;;  %p1911_p0 = scmp.lt.s32.totalorder %s1412_s6, 4 }
  0x65   : > { %s230_s24 = sand.u32 1, %s1392_s26   ;;  %s976_s11 = smul.u32 192, %s1408_s30 }
  0x66   : > { %p96_p1 = por %p95_p11, %p94_p5  ;;  %s975_s16 = smul.u32 12, %s230_s24 }
  0x67   : > { %s1941_s2 = sld [smem:[#allocation32_spill]]  ;;  %s1655_s18 = scalar_lea.sflag [#allocation3], %s230_s24 }
  0x68   : > { %p1644_p4 = pnand %p1911_p0, %p96_p1  ;;  %s234_s27 = scalar_lea.vmem [#allocation8], %s975_s16 }
  0x69   : > { %s241_s28 = sshll.u32 %s234_s27, 4  ;;  %s1653_s28 = int_to_ptr.vmem [resolvable:$true] %s241_s28 }
  0x6a   : > { %p1220_p6 = pneg %p1644_p4 }
  0x6d   : > { %s1651_s5 = scalar_lea.hbm %s1941_s2, %s976_s11  ;;  %s1223_s17 = scalar_lea.hbm %s1941_s2, 384 }
  0x6e   : > { %s1218_s15 = scalar_lea.hbm %s1651_s5, 192  ;;  %p1224_p13 = scmp.lt.u32.totalorder %s1651_s5, %s1941_s2 }
  0x6f   : > { %p1219_p2 = scmp.ne.s32.totalorder %s1651_s5, %s1218_s15  ;;  %p1225_p3 = scmp.lt.u32.totalorder %s1223_s17, %s1218_s15 }
  0x70   : > { %p1227_p9 = scmp.lt.u32.totalorder %s1218_s15, %s1651_s5 }
  0x71   : > { %p1221_p8 = pnand %p1220_p6, %p1219_p2  ;;  %p1226_p7 = por %p1225_p3, %p1224_p13 }
  0x73   : > { %p1222_p12 = pneg %p1221_p8  ;;  %p1228_p10 = por %p1227_p9, %p1226_p7 }
  0x75   : > { %p1229_p5 = pnand %p1228_p10, %p1222_p12 }
  0x77   : > { %1232 = shalt.err (!%p1229_p5)
}
  0x78   : > { %s1233_s24 = scalar_lea.vmem %s1653_s28, 192  ;;  %s1419_s16 = smov [#allocation8]  }
  0x79   : > { %p1234_p1 = scmp.ne.s32.totalorder %s1653_s28, %s1233_s24  ;;  %s1238_s27 = sshll.u32 %s1419_s16, 4  ;;  %s1239_s27 = int_to_ptr.vmem [resolvable:$false] %s1238_s27 }
  0x7a   : > { %s1240_s21 = scalar_lea.vmem %s1239_s27, 384  ;;  %p1241_p0 = scmp.lt.s32.totalorder %s1653_s28, %s1239_s27 }
  0x7b   : > { %p1236_p2 = pnand %p1234_p1, %p1220_p6  ;;  %p1242_p13 = scmp.lt.s32.totalorder %s1240_s21, %s1233_s24 }
  0x7d   : > { %p1237_p8 = pneg %p1236_p2  ;;  %p1243_p3 = por %p1242_p13, %p1241_p0 }
  0x7f   : > { %p1244_p7 = pnand %p1243_p3, %p1237_p8 }
  0x81   : > { %1247 = shalt.err (!%p1244_p7)
}
  0x82   : > { %s1420_s12 = smov 32   ;;  %s1421_s15 = smov 2  }
  0x83   : > { %1017 = dma.hbm_to_vmem [thread:$0]  (!%p1644_p4), %s1651_s5, 192, %s1653_s28, %s1655_s18, %s1420_s12, %s1420_s12, %s1421_s15  }
  0x84   : > { %s87_s11 = sadd.s32 1, %s1392_s26  ;;  %s35_s14 = sadd.s32 1, %s1404_s29 }
  0x85   : > { %p36_p0 = scmp.ge.s32.totalorder %s35_s14, 2  ;;  %s113_s17 = sadd.s32 1, %s1380_s23 }
  0x86   : > { %p120_p6 = scmp.ne.s32.totalorder %s1380_s23, %s1376_s22  ;;  %s162_s24 = sadd.s32 1, %s1368_s20 }
  0x87   : > { %s1986_s14 = smov (%p36_p0, %s35_s14), 0  ;;  %s1943_s16 = sadd.s32 1, %s1408_s30 }
  0x88   : > { %1942 = sst [smem:[#allocation29_spill]] %s1986_s14  ;;  %s1988_s16 = smov (!%p36_p0, %s1943_s16), %s1408_s30 }
  0x89   : > { %s110_s27 = ssub.s32 %s1404_s29, %s1986_s14  ;;  %s251_s21 = sand.u32 1, %s1412_s6  }
  0x8a   : > { %p40_p12 = scmp.ge.s32.totalorder %s1988_s16, 2  ;;  %p111_p4 = scmp.eq.s32.totalorder %s110_s27, 0 }
  0x8b   : > { %p1699_p9 = por %p120_p6, %p95_p11  ;;  %s253_s5 = sand.u32 1, %s1380_s23  }
  0x8c   : > { %s1990_s16 = smov (%p40_p12, %s1988_s16), 0  ;;  %s881_s12 = sshll.u32 %s253_s5, 3 }
  0x8d   : > { %s1707_s28 = scalar_select %p111_p4, %s1380_s23, %s113_s17  }
  0x8e   : > { %s84_s18 = ssub.s32 %s1408_s30, %s1990_s16  ;;  %s917_s2 = sshll.u32 %s1404_s29, 7 }
  0x8f   : > { %p85_p10 = scmp.eq.s32.totalorder %s84_s18, 0  ;;  %s159_s15 = sor.u32 %s110_s27, %s84_s18 }
  0x90   : > { %p160_p5 = scmp.eq.s32.totalorder %s159_s15, 0  ;;  %s255_s4 = scalar_lea.vmem [#allocation9], %s881_s12 }
  0x91   : > { %s1712_s0 = scalar_select %p85_p10, %s1392_s26, %s87_s11  }
  0x92   : > { %s1715_s1 = scalar_select %p160_p5, %s1368_s20, %s162_s24  }
  0x93   : > { %s262_s14 = sshll.u32 %s255_s4, 4  ;;  %s1721_s22 = scalar_lea.hbm %s1897_s3, %s917_s2  ;;  %s1723_s14 = int_to_ptr.vmem [resolvable:$true] %s262_s14 }
  0x94   : > { %p1945_p11 = scmp.lt.s32.totalorder %s1412_s6, 4  ;;  %s1733_s4 = scalar_lea.sflag [#allocation10], %s251_s21 }
  0x95   : > { %s1248_s17 = scalar_lea.hbm %s1721_s22, 128  ;;  %s1253_s10 = scalar_lea.hbm %s1897_s3, 256 }
  0x96   : > { %p1729_p1 = pnand %p1945_p11, %p1699_p9  ;;  %p1249_p2 = scmp.ne.s32.totalorder %s1721_s22, %s1248_s17 }
  0x97   : > { %p1254_p7 = scmp.lt.u32.totalorder %s1721_s22, %s1897_s3  ;;  %p1255_p0 = scmp.lt.u32.totalorder %s1253_s10, %s1248_s17 }
  0x98   : > { %p1250_p8 = pneg %p1729_p1  ;;  %p1257_p12 = scmp.lt.u32.totalorder %s1248_s17, %s1721_s22 }
  0x99   : > { %p1256_p6 = por %p1255_p0, %p1254_p7 }
  0x9a   : > { %p1251_p13 = pnand %p1250_p8, %p1249_p2 }
  0x9b   : > { %p1258_p4 = por %p1257_p12, %p1256_p6 }
  0x9c   : > { %p1252_p3 = pneg %p1251_p13 }
  0x9e   : > { %p1259_p9 = pnand %p1258_p4, %p1252_p3 }
  0xa0   : > { %1262 = shalt.err (!%p1259_p9)
}
  0xa1   : > { %s1263_s21 = scalar_lea.vmem %s1723_s14, 128  ;;  %s1422_s8 = smov [#allocation9]  }
  0xa2   : > { %p1264_p10 = scmp.ne.s32.totalorder %s1723_s14, %s1263_s21  ;;  %s1268_s5 = sshll.u32 %s1422_s8, 4  ;;  %s1269_s5 = int_to_ptr.vmem [resolvable:$false] %s1268_s5 }
  0xa3   : > { %s1270_s18 = scalar_lea.vmem %s1269_s5, 256  ;;  %p1271_p2 = scmp.lt.s32.totalorder %s1723_s14, %s1269_s5 }
  0xa4   : > { %p1266_p5 = pnand %p1264_p10, %p1250_p8  ;;  %p1272_p13 = scmp.lt.s32.totalorder %s1270_s18, %s1263_s21 }
  0xa6   : > { %p1267_p11 = pneg %p1266_p5  ;;  %p1273_p7 = por %p1272_p13, %p1271_p2 }
  0xa8   : > { %p1274_p0 = pnand %p1273_p7, %p1267_p11 }
  0xaa   : > { %1277 = shalt.err (!%p1274_p0)
}
  0xab   : > { %s1947_s12 = smov 4   ;;  %s1948_s15 = smov 64  }
  0xac   : > { %1020 = dma.hbm_to_vmem [thread:$0]  (!%p1729_p1), %s1721_s22, 128, %s1723_s14, %s1733_s4, %s1948_s15, %s1948_s15, %s1947_s12  }
  0xad   : > { %p1949_p8 = scmp.ne.s32.totalorder %s1935_s13, 0 }
  0xae   : > { %p1950_p3 = scmp.eq.s32.totalorder (!%p1949_p8), %s1529_s7, 0 }
  0xaf   : > { %274 = sbr.rel (%p1949_p8) target bundleno = 681 (0x2a9), region = 40 }
  0xb6   : > { %1335 = dma.done.wait (%p1950_p3), [#allocation5], 16   ;;  %p1951_p6 = pmov %p1950_p3 }
  0xb7   : > { %p1952_p12 = pmov %p1950_p3 }
  0xb8   : > { %1337 = vsyncadd (%p1951_p6), [#allocation5], 4294967280 }
  0xb9   : > { %1339 = dma.done.wait (%p1952_p12), [#allocation7], 16   ;;  %p1953_p4 = pmov %p1950_p3 }
  0xba   : > { %s284_s11 = sand.u32 1, %s1388_s25   ;;  %p1954_p1 = scmp.ne.s32.totalorder %s1928_s9, 0 }
  0xbb   : > { %1341 = vsyncadd (%p1953_p4), [#allocation7], 4294967280  ;;  %s977_s17 = smul.u32 12, %s284_s11  ;;  %s285_s22 = scalar_lea.sflag [#allocation3], %s284_s11 }
  0xbd   : > { %s1775_s14 = scalar_lea.vmem [#allocation8], %s977_s17 }
  0xbe   : > { %1343 = dma.done.wait (%p1954_p1), %s285_s22, 192  }
  0xbf   : > { %1345 = vsyncadd (%p1954_p1), %s285_s22, 4294967104  ;;  %s1955_s13 = sld [smem:[#allocation23_spill]]  ;;  %s1956_s4 = sld [smem:[#allocation26_spill]] }
  0xc0   : > { %s293_s2 = sand.u32 1, %s1529_s7  }
  0xc1   : > { %s294_s24 = scalar_lea.sflag [#allocation10], %s293_s2 }
  0xc5   : > { %s295_s19 = sand.u32 1, %s1955_s13   ;;  %p1957_p9 = scmp.ne.s32.totalorder %s1956_s4, 0 }
  0xc6   : > { %s887_s10 = sshll.u32 %s295_s19, 3 }
  0xc7   : > { %s297_s27 = scalar_lea.vmem [#allocation9], %s887_s10 }
  0xc8   : > { %1347 = dma.done.wait (%p1957_p9), %s294_s24, 128  }
  0xc9   : > { %1349 = vsyncadd (%p1957_p9), %s294_s24, 4294967168  ;;  %p1958_p10 = pmov %p1950_p3 }
  0xca   : > { %p1959_p5 = pmov %p1950_p3 }
  0xcb   : > { %1351 = dma.done.wait (%p1958_p10), [#allocation10], 192  }
  0xcc   : > { %1353 = vsyncadd (%p1959_p5), [#allocation10], 4294967104 }
  0xcd   : > { %306 = sfence }
  0xce   : > { %v342_v0 = vld [vmem:[%s1775_s14] sm:$0x3]  ;;  %v343_v1 = vld [vmem:[%s1775_s14 + $0x2] sm:$0x3]  ;;  %v1423_v2 = vmov 0.0   ;;  %vm1424_vm0 = vmmov 0  }
  0xcf   : > { %933 = vmatprep.subr.bf16.mxu0 %v1423_v2  ;;  %v344_v3 = vunpack.c.l.u8.bf16 %v342_v0  ;;  %v345_v4 = vunpack.c.l.u8.bf16 %v343_v1  ;;  %935 = vmatprep.mubr.msk.bf16.mxu0 %vm1424_vm0, %v1423_v2  ;;  %v895_v5 = vld [vmem:[%s1775_s14 + $0x4] sm:$0x3]  ;;  %v896_v6 = vld [vmem:[%s1775_s14 + $0x6] sm:$0x3]  ;;  %v1161_v10 = vld [vmem:[%s297_s27] sm:$0xff]   ;;  %vm357_vm1 = vcmask 130048  }
  0xd0   : > { %939 = vmatprep.subr.bf16.mxu1 %v1423_v2  ;;  %943 = vmatprep.mubr.msk.bf16.mxu1 %vm1424_vm0, %v1423_v2  ;;  %v474_v8 = vunpack.c.l.u8.bf16 %v895_v5  ;;  %v475_v9 = vunpack.c.l.u8.bf16 %v896_v6  ;;  %v1162_v11 = vld [vmem:[#allocation11] sm:$0xff]   ;;  %v1163_v18 = vld [vmem:[#allocation11 + $0x8] ss:$0 sps:$4 sm:$0x33]   ;;  %vm416_vm2 = vcmask 1041408   ;;  %vm412_vm3 = vcmask 162816  }
  0xd1   : > { %v890_v7 = vcombine.low %v344_v3, %v345_v4  ;;  %v904_v13 = vld [vmem:[%s1775_s14 + $0x8] sm:$0x3]  ;;  %v905_v14 = vld [vmem:[%s1775_s14 + $0xa] sm:$0x3]  ;;  %940 = vmatpush3.bf16.msra.mxu1 %v1162_v11  ;;  %v418_v19 = vsel %vm416_vm2, %v1163_v18, 0  ;;  %s1960_s7 = sld [smem:[#allocation22_spill]] }
  0xd2   : > { %v897_v12 = vcombine.low %v474_v8, %v475_v9  ;;  %941 = vmatprep.subr.bf16.mxu1 %v1423_v2  ;;  %v582_v15 = vunpack.c.l.u8.bf16 %v904_v13  ;;  %v583_v16 = vunpack.c.l.u8.bf16 %v905_v14  ;;  %s461_s21 = sld [smem:[#allocation2]]  ;;  %s900_s18 = sld [smem:[#allocation2 + $0x1]] }
  0xd3   : > { %934 = vmatpush3.bf16.msra.mxu0 %v890_v7  ;;  %s465_s8 = sld [smem:[#allocation6]]  ;;  %s901_s12 = sld [smem:[#allocation6 + $0x1]] }
  0xd4   : > { %947 = vmatprep.subr.bf16.mxu0 %v1423_v2  ;;  %v906_v17 = vcombine.low %v582_v15, %v583_v16  ;;  %s909_s11 = sld [smem:[#allocation2 + $0x2]] }
  0xd5   : > { %942 = vmatpush3.bf16.msra.mxu1 %v418_v19  ;;  %s910_s17 = sld [smem:[#allocation6 + $0x2]] }
  0xd6   : > { %936 = vmatmul.mubr.msk.bf16.vlgmr.msra.gmra.mrb[0].mxu0 %vm357_vm1, %v1161_v10  ;;  %953 = vmatprep.subr.bf16.mxu1 %v1423_v2 }
  0xd7   : > { %948 = vmatpush3.bf16.msra.mxu0 %v897_v12  ;;  %949 = vmatprep.mubr.msk.bf16.mxu0 %vm1424_vm0, %v1423_v2  ;;  %s331_s9 = sand.u32 1, %s1960_s7  }
  0xd8   : > { %961 = vmatprep.subr.bf16.mxu0 %v1423_v2  ;;  %s978_s5 = smul.u32 48, %s331_s9  ;;  %v462_v35 = vstv %s461_s21  ;;  %v569_v45 = vstv %s900_s18  ;;  %s688_s22 = scalar_lea.sflag [#allocation4], %s331_s9 }
  0xd9   : > { %v466_v37 = vstv %s465_s8  ;;  %v573_v47 = vstv %s901_s12 }
  0xda   : > { %s1812_s15 = scalar_lea.vmem [#allocation12], %s978_s5  ;;  %v677_v55 = vstv %s909_s11 }
  0xdb   : > { %v681_v57 = vstv %s910_s17 }
  0xde   : > { %950 = vmatmul.mubr.msk.bf16.vlgmr.msra.gmra.mrb[4].mxu0 %vm357_vm1, %v1161_v10 }
  0xdf   : > { %962 = vmatpush3.bf16.msra.mxu0 %v906_v17  ;;  %963 = vmatprep.mubr.msk.bf16.mxu0 %vm1424_vm0, %v1423_v2 }
  0xe6   : > { %964 = vmatmul.mubr.msk.bf16.vlgmr.msra.gmra.mrb[8].mxu0 %vm357_vm1, %v1161_v10 }
 0x1a9   : > { %v395_v20 = vpop.f32.mrb[0].mxu0 }
 0x1aa   : > { %v937_v21 = vpop.f32.mrb[1].mxu0 }
 0x1ab   : > { %v398_v22 = vpop.f32.mrb[2].mxu0 }
 0x1ac   : > { %v402_v23 = vpack.c.bf16 %v398_v22, %v395_v20  ;;  %v938_v24 = vpop.f32.mrb[3].mxu0 }
 0x1ae   : > { %944 = vmatmul.mubr.msk.bf16.vlgmr.msra.gmra.mrb[0].mxu1 %vm412_vm3, %v402_v23 }
 0x1af   : > { %954 = vmatpush3.bf16.msra.mxu1 %v1162_v11  ;;  %957 = vmatprep.mubr.msk.bf16.mxu1 %vm1424_vm0, %v1423_v2 }
 0x1b0   : > { %955 = vmatprep.subr.bf16.mxu1 %v1423_v2 }
 0x1b1   : > { %v516_v25 = vpop.f32.mrb[4].mxu0 }
 0x1b2   : > { %v951_v26 = vpop.f32.mrb[5].mxu0 }
 0x1b3   : > { %v519_v27 = vpop.f32.mrb[6].mxu0  ;;  %956 = vmatpush3.bf16.msra.mxu1 %v418_v19 }
 0x1b4   : > { %v523_v28 = vpack.c.bf16 %v519_v27, %v516_v25  ;;  %v952_v29 = vpop.f32.mrb[7].mxu0  ;;  %967 = vmatprep.subr.bf16.mxu1 %v1423_v2 }
 0x1b6   : > { %958 = vmatmul.mubr.msk.bf16.vlgmr.msra.gmra.mrb[4].mxu1 %vm412_vm3, %v523_v28 }
 0x1b7   : > { %968 = vmatpush3.bf16.msra.mxu1 %v1162_v11  ;;  %971 = vmatprep.mubr.msk.bf16.mxu1 %vm1424_vm0, %v1423_v2 }
 0x1b8   : > { %969 = vmatprep.subr.bf16.mxu1 %v1423_v2 }
 0x1b9   : > { %v624_v30 = vpop.f32.mrb[8].mxu0 }
 0x1ba   : > { %v965_v31 = vpop.f32.mrb[9].mxu0 }
 0x1bb   : > { %v627_v32 = vpop.f32.mrb[10].mxu0  ;;  %970 = vmatpush3.bf16.msra.mxu1 %v418_v19 }
 0x1bc   : > { %v631_v33 = vpack.c.bf16 %v627_v32, %v624_v30  ;;  %v966_v34 = vpop.f32.mrb[11].mxu0 }
 0x1be   : > { %972 = vmatmul.mubr.msk.bf16.vlgmr.msra.gmra.mrb[8].mxu1 %vm412_vm3, %v631_v33 }
 0x281   : > { %v454_v36 = vpop.f32.mrb[0].mxu1 }
 0x282   : > { %v463_v38 = vmul.f32 %v462_v35, %v454_v36  ;;  %v945_v39 = vpop.f32.mrb[1].mxu1 }
 0x283   : > { %v457_v40 = vpop.f32.mrb[2].mxu1 }
 0x284   : > { %v467_v41 = vsub.f32 %v463_v38, %v466_v37  ;;  %v464_v42 = vmul.f32 %v462_v35, %v457_v40  ;;  %v946_v43 = vpop.f32.mrb[3].mxu1 }
 0x286   : > { %469 = vst [vmem:[%s1812_s15] sm:$0xff] %v467_v41  ;;  %v468_v44 = vsub.f32 %v464_v42, %v466_v37 }
 0x288   : > { %470 = vst [vmem:[%s1812_s15 + $0x8] sm:$0xff] %v468_v44 }
 0x289   : > { %v561_v46 = vpop.f32.mrb[4].mxu1 }
 0x28a   : > { %v570_v48 = vmul.f32 %v569_v45, %v561_v46  ;;  %v959_v49 = vpop.f32.mrb[5].mxu1 }
 0x28b   : > { %v564_v50 = vpop.f32.mrb[6].mxu1 }
 0x28c   : > { %v574_v51 = vsub.f32 %v570_v48, %v573_v47  ;;  %v571_v52 = vmul.f32 %v569_v45, %v564_v50  ;;  %v960_v53 = vpop.f32.mrb[7].mxu1 }
 0x28e   : > { %902 = vst [vmem:[%s1812_s15 + $0x10] sm:$0xff] %v574_v51  ;;  %v575_v54 = vsub.f32 %v571_v52, %v573_v47 }
 0x290   : > { %903 = vst [vmem:[%s1812_s15 + $0x18] sm:$0xff] %v575_v54 }
 0x291   : > { %v669_v56 = vpop.f32.mrb[8].mxu1 }
 0x292   : > { %v678_v58 = vmul.f32 %v677_v55, %v669_v56  ;;  %v973_v59 = vpop.f32.mrb[9].mxu1 }
 0x293   : > { %v672_v60 = vpop.f32.mrb[10].mxu1 }
 0x294   : > { %v682_v61 = vsub.f32 %v678_v58, %v681_v57  ;;  %v679_v62 = vmul.f32 %v677_v55, %v672_v60  ;;  %v974_v63 = vpop.f32.mrb[11].mxu1 }
 0x296   : > { %911 = vst [vmem:[%s1812_s15 + $0x20] sm:$0xff] %v682_v61  ;;  %v683_v0 = vsub.f32 %v679_v62, %v681_v57 }
 0x298   : > { %912 = vst [vmem:[%s1812_s15 + $0x28] sm:$0xff] %v683_v0 }
 0x299   : > { %s1961_s14 = sld [smem:[#allocation24_spill]]  ;;  %s1962_s13 = sld [smem:[#allocation25_spill]] }
 0x29a   : > { %s1963_s4 = sld [smem:[#allocation27_spill]]  ;;  %s719_s10 = sshll.u32 %s1812_s15, 4  ;;  %s720_s10 = int_to_ptr.vmem [resolvable:$true] %s719_s10 }
 0x29b   : > { %s1425_s21 = smov 256   ;;  %s1965_s8 = sld [smem:[#allocation34_spill]] }
 0x29c   : > { %s1426_s18 = smov 512   ;;  %s1427_s12 = smov 2  }
 0x29d   : > { %s1428_s11 = smov 128   ;;  %s1429_s15 = smov 8  }
 0x29e   : > { %s1430_s17 = smov [#allocation13]  }
 0x29f   : > { %s913_s2 = sshll.u32 %s1961_s14, 1  ;;  %s979_s19 = smul.u32 12, %s1962_s13 }
 0x2a0   : > { %p1964_p11 = scmp.ne.s32.totalorder %s1963_s4, 0  ;;  %s1431_s14 = smov 0  }
 0x2a1   : > { %s700_s24 = sadd.s32 %s979_s19, %s913_s2 }
 0x2a2   : > { %s914_s27 = sshll.u32 %s700_s24, 7  ;;  %996 = sst [smem:[#allocation14]] (%p1964_p11), %s1425_s21 }
 0x2a3   : > { %s702_s5 = scalar_lea.hbm %s1965_s8, %s914_s27  ;;  %997 = sst [smem:[#allocation14 + $0x1]] (%p1964_p11), %s1426_s18 }
 0x2a4   : > { %998 = sst [smem:[#allocation14 + $0x2]] (%p1964_p11), %s1427_s12 }
 0x2a5   : > { %999 = sst [smem:[#allocation14 + $0x3]] (%p1964_p11), %s1428_s11 }
 0x2a6   : > { %1000 = sst [smem:[#allocation14 + $0x4]] (%p1964_p11), %s1428_s11 }
 0x2a7   : > { %1001 = sst [smem:[#allocation14 + $0x5]] (%p1964_p11), %s1429_s15 }
 0x2a8   : > { %1002 = dma.general (%p1964_p11), %s720_s10, 768, %s702_s5, %s688_s22, %s1430_s17, [#allocation14], %s1431_s14, 0  }
 0x2a9 PF: > { %s1966_s13 = sld [smem:[#allocation21_spill]]  ;;  %s1967_s2 = sld [smem:[#allocation28_spill]] }
 0x2aa   : > { %p1032_p2 = scmp.ge.s32.totalorder %s1412_s6, 2 }
 0x2af   : > { %s747_s19 = sand.u32 1, %s1966_s13   ;;  %p1968_p13 = scmp.ne.s32.totalorder %s1967_s2, 0 }
 0x2b0   : > { %s748_s24 = scalar_lea.sflag [#allocation4], %s747_s19 }
 0x2b1   : > { %p1022_p7 = pnand %p1032_p2, %p1968_p13 }
 0x2b3   : > { %1355 = dma.done.wait (!%p1022_p7), %s748_s24, 768  }
 0x2b4   : > { %1357 = vsyncadd (!%p1022_p7), %s748_s24, 4294966528  ;;  %s26_s6 = sadd.s32 1, %s1412_s6   ;;  %s1970_s18 = sld [smem:[#allocation22_spill]] }
 0x2b5   : > { %p1847_p0 = scmp.ge.s32.totalorder %s26_s6, 6   ;;  %s1971_s21 = sld [smem:[#allocation23_spill]] }
 0x2b6   : > { %s1972_s4 = sld [smem:[#allocation29_spill]]  ;;  %s1974_s19 = smov %s1368_s20 }
 0x2b7   : > { %s1975_s20 = smov %s1715_s1  ;;  %s1976_s22 = smov %s1380_s23 }
 0x2b8   : > { %s1977_s23 = smov %s1707_s28  ;;  %s1978_s24 = smov %s1388_s25 }
 0x2b9   : > { %s1979_s25 = smov %s1392_s26  ;;  %s1980_s26 = smov %s1712_s0 }
 0x2ba   : > { %s1981_s27 = smov %s1404_s29  ;;  %s1982_s28 = smov %s1408_s30 }
 0x2bb   : > { %s1984_s30 = smov %s1990_s16  ;;  %25 = sbr.rel (!%p1847_p0) target bundleno = 20 (0x14), region = 120 }
 0x2bc   : > { %s1983_s29 = smov %s1972_s4 }
 0x2c2   :  { %753 = vsyncpa [#allocation3], 1 }
 0x2c3   :  { %755 = vsyncpa [#allocation3 + $0x1], 1 }
 0x2c4   :  { %756 = vsyncpa [#allocation10], 1 }
 0x2c5   :  { %758 = vsyncpa [#allocation10 + $0x1], 1 }
 0x2c6   :  { %759 = vsyncpa [#allocation4], 1 }
 0x2c7   :  { %761 = vsyncpa [#allocation4 + $0x1], 1 }
 0x2c8   :  { %762 = vsyncpa [#allocation5], 1 }
 0x2c9   :  { %764 = vsyncpa [#allocation5 + $0x1], 1 }
 0x2ca   :  { %765 = vsyncpa [#allocation7], 1 }

</bundles_post_ra>
